<compile_context>
chip_gen: v5e
topology: v5e:2x2
jax: 0.10.0
libtpu: 0.0.40
codegen_flags: <defaults>
</compile_context>

<pallas_src>
import functools
import math

import jax
import jax.numpy as jnp
from jax.experimental import pallas as pl
from jax.experimental.pallas import tpu as pltpu


def _round_up(x, m):
    return (x + m - 1) // m * m


def _vmem_capacity_bytes():
    """Per-core VMEM capacity; conservative fallback (v7x has 64 MiB per TC)."""
    try:
        cap = getattr(pltpu.get_tpu_info(), "vmem_capacity_bytes", None)
        if cap:
            return int(cap)
    except Exception:
        pass
    return 64 * 1024 * 1024


def kg_learner_kernel(adj_ref, sub_ref, evt_ref, ss_ref, es_ref, mask_ref,
                      out_ref, m_sc=None, l_sc=None, acc_sc=None,
                      *, tk, sub_resident, single_step):
    """One (TM, TK) attention tile; online softmax over the sub-event axis."""
    # adj is a 0/1 graph adjacency: only a non-zero predicate is needed.
    # TODO(synk): if adj can carry non-binary edge weights, stream adj values
    # (bf16) and multiply instead of using the predicate.
    adj_nz = adj_ref[...].astype(jnp.float32) > 0.0        # (TM, TK)

    t = es_ref[...] + ss_ref[...]                          # (TM,1)+(1,TK) -> (TM,TK)
    lrelu = jnp.maximum(t, 0.2 * t)                        # LeakyReLU(0.2)
    # adj==0 -> LeakyReLU(0) == 0; padded S columns get -1e30 from the mask row.
    score = jnp.where(adj_nz, lrelu, 0.0) + mask_ref[...]

    if sub_resident:
        start = pl.multiple_of(pl.program_id(1) * tk, 128)
        sub = sub_ref[pl.ds(start, tk), :]                 # (TK, D) slice of resident sub
    else:
        sub = sub_ref[...]                                 # streamed (TK, D) tile

    if single_step:
        # Whole S axis in one tile: plain softmax, no scratch, no rescale.
        m = jnp.max(score, axis=-1, keepdims=True)
        p = jnp.exp(score - m)
        l = jnp.sum(p, axis=-1, keepdims=True)
        weighted = jnp.where(adj_nz, p, 0.0).astype(jnp.bfloat16)
        acc = jnp.dot(weighted, sub, preferred_element_type=jnp.float32)
        out_ref[...] = ((evt_ref[...] + acc / l) * 0.5).astype(out_ref.dtype)
        return

    k = pl.program_id(1)

    @pl.when(k == 0)
    def _init():
        m_sc[...] = jnp.full(m_sc.shape, -jnp.inf, dtype=m_sc.dtype)
        l_sc[...] = jnp.zeros(l_sc.shape, dtype=l_sc.dtype)
        acc_sc[...] = jnp.zeros(acc_sc.shape, dtype=acc_sc.dtype)

    # Online softmax update.
    m_prev = m_sc[...]
    m_new = jnp.maximum(m_prev, jnp.max(score, axis=-1, keepdims=True))
    alpha = jnp.exp(m_prev - m_new)
    p = jnp.exp(score - m_new)                             # (TM, TK)
    l_sc[...] = alpha * l_sc[...] + jnp.sum(p, axis=-1, keepdims=True)

    # Partial sevt_evt: bf16 in / f32 MXU accumulation.
    weighted = jnp.where(adj_nz, p, 0.0).astype(jnp.bfloat16)
    acc_sc[...] = alpha * acc_sc[...] + jnp.dot(
        weighted, sub, preferred_element_type=jnp.float32)
    m_sc[...] = m_new

    @pl.when(k == pl.num_programs(1) - 1)
    def _finalize():
        # Exact divide: runs once per E-block, so exactness is free.
        out_ref[...] = ((evt_ref[...] + acc_sc[...] / l_sc[...]) * 0.5
                        ).astype(out_ref.dtype)


@functools.partial(jax.jit, static_argnames=("tm", "tk", "sub_resident"))
def kg_learner_forward(adj, subevent, event, attn_weight, *,
                       tm=None, tk=None, sub_resident=None):
    """adj:(E,S) 0/1, subevent:(S,D), event:(E,D), attn_weight:(1,2D) torch layout."""
    E, S = adj.shape
    D = subevent.shape[1]
    out_dtype = subevent.dtype
    f32 = jnp.float32

    d_pad = _round_up(D, 128)
    vmem_cap = _vmem_capacity_bytes()
    budget = vmem_cap // 2                      # headroom for Mosaic internals

    # --- tile selection (static Python on static shapes) --------------------
    # tm: multiple of 32 (int8 adj sublane packing); keep >= 2 row-blocks so
    # the "parallel" E axis spans both TensorCores on v7x.
    if tm is None:
        tm = min(256, _round_up(max((E + 1) // 2, 1), 32))
    else:
        tm = _round_up(tm, 32)
    e_pad = _round_up(E, tm)

    s_full = _round_up(S, 128)
    sub_bytes = 2 * s_full * d_pad * 2          # bf16, x2 pipeline buffers (conservative)
    if sub_resident is None:
        sub_resident = sub_bytes <= budget // 3

    if tk is None:
        out_b = jnp.dtype(out_dtype).itemsize
        fixed = (2 * tm * d_pad * 4             # event tile (f32), double buffered
                 + 2 * tm * d_pad * out_b       # output tile
                 + tm * d_pad * 4)              # f32 accumulator scratch
        if sub_resident:
            fixed += sub_bytes
        per_col = 2 * (tm + 4 + 4 + (0 if sub_resident else 2 * d_pad))
        tk = max(128, min(s_full, (budget - fixed) // per_col // 128 * 128))
    else:
        tk = _round_up(tk, 128)
    s_pad = _round_up(S, tk)
    num_k = s_pad // tk
    single_step = num_k == 1

    # --- hoisted projections (E-/S-invariant matvecs, plain XLA) ------------
    # torch Linear(2D, 1, bias=False): score = concat([sevt, evt], -1) @ W.T
    w_s = attn_weight[0, :D].astype(f32)
    w_e = attn_weight[0, D:].astype(f32)
    ss = subevent.astype(f32) @ w_s             # (S,)
    es = event.astype(f32) @ w_e                # (E,)

    # --- pad + lay out inputs (fused under jit) ------------------------------
    adj_p = jnp.zeros((e_pad, s_pad), jnp.int8).at[:E, :S].set(
        (adj != 0).astype(jnp.int8))
    sub_p = jnp.zeros((s_pad, d_pad), jnp.bfloat16).at[:S, :D].set(
        subevent.astype(jnp.bfloat16))
    evt_p = jnp.zeros((e_pad, d_pad), f32).at[:E, :D].set(event.astype(f32))
    ss_p = jnp.zeros((1, s_pad), f32).at[0, :S].set(ss)
    es_p = jnp.zeros((e_pad, 1), f32).at[:E, 0].set(es)
    # Additive softmax mask for padded sub-event columns.
    mask_p = jnp.where(jnp.arange(s_pad) < S, 0.0, -1e30
                       ).astype(f32).reshape(1, s_pad)

    grid = (e_pad // tm, num_k)
    if sub_resident:
        sub_spec = pl.BlockSpec((s_pad, d_pad), lambda i, k: (0, 0))   # fetched once
    else:
        sub_spec = pl.BlockSpec((tk, d_pad), lambda i, k: (k, 0))      # streamed

    kernel = functools.partial(kg_learner_kernel, tk=tk,
                               sub_resident=sub_resident,
                               single_step=single_step)
    scratch = [] if single_step else [
        pltpu.VMEM((tm, 1), f32),       # running row max m
        pltpu.VMEM((tm, 1), f32),       # running row sum l
        pltpu.VMEM((tm, d_pad), f32),   # output accumulator
    ]

    out_p = pl.pallas_call(
        kernel,
        out_shape=jax.ShapeDtypeStruct((e_pad, d_pad), out_dtype),
        grid_spec=pltpu.PrefetchScalarGridSpec(
            num_scalar_prefetch=0,
            grid=grid,
            in_specs=[
                pl.BlockSpec((tm, tk), lambda i, k: (i, k)),       # adj tile (int8, 0/1)
                sub_spec,                                          # subevent (bf16)
                pl.BlockSpec((tm, d_pad), lambda i, k: (i, 0)),    # event tile (f32)
                pl.BlockSpec((1, tk), lambda i, k: (0, k)),        # subevent . w_s
                pl.BlockSpec((tm, 1), lambda i, k: (i, 0)),        # event . w_e
                pl.BlockSpec((1, tk), lambda i, k: (0, k)),        # additive pad mask
            ],
            out_specs=pl.BlockSpec((tm, d_pad), lambda i, k: (i, 0)),
            scratch_shapes=scratch,
        ),
        compiler_params=pltpu.CompilerParams(
            dimension_semantics=("parallel", "arbitrary"),
            vmem_limit_bytes=int(vmem_cap * 0.75),
        ),
    )(adj_p, sub_p, evt_p, ss_p, es_p, mask_p)

    return out_p[:E, :D]


def _reference(adj, subevent, event, attn_weight):
    """Pure-JAX reference mirroring the PyTorch forward literally (f32)."""
    E, S = adj.shape
    adj_f = adj.astype(jnp.float32)
    evt = event.astype(jnp.float32)[:, None, :] * adj_f[:, :, None]        # (E,S,D)
    sevt = subevent.astype(jnp.float32)[None, :, :] * adj_f[:, :, None]    # (E,S,D)
    concat = jnp.concatenate([sevt, evt], axis=-1)                         # (E,S,2D)
    out_attn = jnp.einsum("esk,ok->eso", concat,
                          attn_weight.astype(jnp.float32))[..., 0]
    out_attn = jnp.where(out_attn > 0, out_attn, 0.2 * out_attn)
    attn = jax.nn.softmax(out_attn.reshape(E, S), axis=-1)
    sevt_evt = jnp.sum(attn[:, :, None] * sevt, axis=1)
    return ((event.astype(jnp.float32) + sevt_evt) / 2).astype(subevent.dtype)


if __name__ == "__main__":
    # Small shapes: num_evt=48, num_sevt=300, embed_dim=32.
    E, S, D = 48, 300, 32
    key = jax.random.PRNGKey(0)
    k_adj, k_sub, k_evt, k_w1, _ = jax.random.split(key, 5)

    # Dense 0/1 adjacency (stands in for the sparse adj .to_dense()).
    adj = (jax.random.uniform(k_adj, (E, S)) > 0.5).astype(jnp.float32)
    subevent = jax.random.normal(k_sub, (S, D), dtype=jnp.float32)
    event = jax.random.normal(k_evt, (E, D), dtype=jnp.float32)

    # Xavier-uniform init, matching torch.nn.init.xavier_uniform_.
    bound_attn = math.sqrt(6.0 / (2 * D + 1))
    attn_weight = jax.random.uniform(k_w1, (1, 2 * D), jnp.float32,
                                     -bound_attn, bound_attn)
    # self.out_fc exists in the torch module but is never used in forward().

    ref = _reference(adj, subevent, event, attn_weight)

    configs = [
        dict(),                                    # auto tiles: single-K-step fast path
        dict(tm=32, tk=128),                       # online-softmax path, resident subevent
        dict(tm=32, tk=128, sub_resident=False),   # online-softmax path, streamed subevent
    ]
    for cfg in configs:
        out = jax.block_until_ready(
            kg_learner_forward(adj, subevent, event, attn_weight, **cfg))
        assert out.shape == (E, D) and out.dtype == subevent.dtype
        # bf16 matmul inputs => relaxed tolerance vs the f32 reference.
        max_err = float(jnp.max(jnp.abs(out.astype(jnp.float32)
                                        - ref.astype(jnp.float32))))
        assert max_err < 5e-2, f"cfg={cfg}: mismatch vs reference, max abs err={max_err}"

    print("KERNEL_OK")
</pallas_src>

<mosaic_0001>
module attributes {stable_mosaic.version = 11 : i64} {
  func.func @kg_learner_kernel(%arg0: i32, %arg1: i32, %arg2: memref<32x384xi8, #tpu.memory_space<vmem>>, %arg3: memref<384x128xbf16, #tpu.memory_space<vmem>>, %arg4: memref<32x128xf32, #tpu.memory_space<vmem>>, %arg5: memref<1x384xf32, #tpu.memory_space<vmem>>, %arg6: memref<32x1xf32, #tpu.memory_space<vmem>>, %arg7: memref<1x384xf32, #tpu.memory_space<vmem>>, %arg8: memref<32x128xf32, #tpu.memory_space<vmem>>) attributes {dimension_semantics = [#tpu.dimension_semantics<parallel>, #tpu.dimension_semantics<arbitrary>], iteration_bounds = array<i64: 2, 1>, scalar_prefetch = 0 : i64, scratch_operands = 0 : i64, tpu.core_type = #tpu.core_type<tc>, window_params = [{transform_indices = @transform_0, window_bounds = array<i64: 32, 384>}, {pipeline_mode = #tpu.pipeline_mode<synchronous>, transform_indices = @transform_1, window_bounds = array<i64: 384, 128>}, {transform_indices = @transform_2, window_bounds = array<i64: 32, 128>}, {transform_indices = @transform_3, window_bounds = array<i64: 1, 384>}, {transform_indices = @transform_4, window_bounds = array<i64: 32, 1>}, {transform_indices = @transform_5, window_bounds = array<i64: 1, 384>}, {transform_indices = @transform_6, window_bounds = array<i64: 32, 128>}]} {
    %c0 = arith.constant 0 : index
    %c0_0 = arith.constant 0 : index
    %0 = vector.load %arg2[%c0, %c0_0] : memref<32x384xi8, #tpu.memory_space<vmem>>, vector<32x384xi8>
    %1 = arith.sitofp %0 : vector<32x384xi8> to vector<32x384xf32>
    %cst = arith.constant 0.000000e+00 : f32
    %2 = vector.broadcast %cst : f32 to vector<32x384xf32>
    %3 = arith.cmpf ogt, %1, %2 : vector<32x384xf32>
    %c0_1 = arith.constant 0 : index
    %c0_2 = arith.constant 0 : index
    %4 = vector.load %arg6[%c0_1, %c0_2] : memref<32x1xf32, #tpu.memory_space<vmem>>, vector<32x1xf32>
    %c0_3 = arith.constant 0 : index
    %c0_4 = arith.constant 0 : index
    %5 = vector.load %arg5[%c0_3, %c0_4] : memref<1x384xf32, #tpu.memory_space<vmem>>, vector<1x384xf32>
    %6 = vector.broadcast %4 : vector<32x1xf32> to vector<32x384xf32>
    %7 = vector.broadcast %5 : vector<1x384xf32> to vector<32x384xf32>
    %8 = arith.addf %6, %7 : vector<32x384xf32>
    %cst_5 = arith.constant 2.000000e-01 : f32
    %9 = vector.broadcast %cst_5 : f32 to vector<32x384xf32>
    %10 = arith.mulf %9, %8 : vector<32x384xf32>
    %11 = arith.maximumf %8, %10 : vector<32x384xf32>
    %cst_6 = arith.constant 0.000000e+00 : f32
    %12 = vector.broadcast %cst_6 : f32 to vector<32x384xf32>
    %13 = arith.select %3, %11, %12 : vector<32x384xi1>, vector<32x384xf32>
    %c0_7 = arith.constant 0 : index
    %c0_8 = arith.constant 0 : index
    %14 = vector.load %arg7[%c0_7, %c0_8] : memref<1x384xf32, #tpu.memory_space<vmem>>, vector<1x384xf32>
    %15 = vector.broadcast %14 : vector<1x384xf32> to vector<32x384xf32>
    %16 = arith.addf %13, %15 : vector<32x384xf32>
    %c384_i32 = arith.constant 384 : i32
    %17 = arith.muli %arg1, %c384_i32 : i32
    %18 = tpu.assume_multiple %17, 128 : i32
    %19 = arith.index_cast %18 : i32 to index
    %c0_9 = arith.constant 0 : index
    %20 = vector.load %arg3[%19, %c0_9] : memref<384x128xbf16, #tpu.memory_space<vmem>>, vector<384x128xbf16>
    %cst_10 = arith.constant dense<0xFF800000> : vector<32xf32>
    %21 = vector.multi_reduction <maximumf>, %16, %cst_10 [1] : vector<32x384xf32> to vector<32xf32>
    %22 = vector.shape_cast %21 : vector<32xf32> to vector<32x1xf32>
    %23 = vector.broadcast %22 : vector<32x1xf32> to vector<32x384xf32>
    %24 = arith.subf %16, %23 : vector<32x384xf32>
    %25 = math.exp %24 : vector<32x384xf32>
    %cst_11 = arith.constant dense<0.000000e+00> : vector<32xf32>
    %26 = vector.multi_reduction <add>, %25, %cst_11 [1] : vector<32x384xf32> to vector<32xf32>
    %27 = vector.shape_cast %26 : vector<32xf32> to vector<32x1xf32>
    %cst_12 = arith.constant 0.000000e+00 : f32
    %28 = vector.broadcast %cst_12 : f32 to vector<32x384xf32>
    %29 = arith.select %3, %25, %28 : vector<32x384xi1>, vector<32x384xf32>
    %30 = arith.truncf %29 : vector<32x384xf32> to vector<32x384xbf16>
    %cst_13 = arith.constant dense<0.000000e+00> : vector<32x128xf32>
    %31 = tpu.matmul %30, %20, %cst_13 {dimension_numbers = #tpu.dot_dimension_numbers<[1], [0], [0], [1], [0, 0, 1, 1], [], []>} : vector<32x384xbf16>, vector<384x128xbf16>, vector<32x128xf32> -> vector<32x128xf32>
    %c0_14 = arith.constant 0 : index
    %c0_15 = arith.constant 0 : index
    %32 = vector.load %arg4[%c0_14, %c0_15] : memref<32x128xf32, #tpu.memory_space<vmem>>, vector<32x128xf32>
    %33 = vector.broadcast %27 : vector<32x1xf32> to vector<32x128xf32>
    %34 = arith.divf %31, %33 : vector<32x128xf32>
    %35 = arith.addf %32, %34 : vector<32x128xf32>
    %cst_16 = arith.constant 5.000000e-01 : f32
    %36 = vector.broadcast %cst_16 : f32 to vector<32x128xf32>
    %37 = arith.mulf %35, %36 : vector<32x128xf32>
    %c0_17 = arith.constant 0 : index
    %c0_18 = arith.constant 0 : index
    %38 = vector.load %arg8[%c0_17, %c0_18] : memref<32x128xf32, #tpu.memory_space<vmem>>, vector<32x128xf32>
    tpu.vector_store %arg8[%c0_17, %c0_18], %37 {strides = array<i32>} : memref<32x128xf32, #tpu.memory_space<vmem>>, vector<32x128xf32>,
    return
  }
  func.func @transform_0(%arg0: i32, %arg1: i32) -> (i32, i32) {
    %c0_i32 = arith.constant 0 : i32
    return %arg0, %arg1 : i32, i32
  }
  func.func @transform_1(%arg0: i32, %arg1: i32) -> (i32, i32) {
    %c0_i32 = arith.constant 0 : i32
    %c0_i32_0 = arith.constant 0 : i32
    %c0_i32_1 = arith.constant 0 : i32
    return %c0_i32, %c0_i32_0 : i32, i32
  }
  func.func @transform_2(%arg0: i32, %arg1: i32) -> (i32, i32) {
    %c0_i32 = arith.constant 0 : i32
    %c0_i32_0 = arith.constant 0 : i32
    return %arg0, %c0_i32 : i32, i32
  }
  func.func @transform_3(%arg0: i32, %arg1: i32) -> (i32, i32) {
    %c0_i32 = arith.constant 0 : i32
    %c0_i32_0 = arith.constant 0 : i32
    return %c0_i32, %arg1 : i32, i32
  }
  func.func @transform_4(%arg0: i32, %arg1: i32) -> (i32, i32) {
    %c0_i32 = arith.constant 0 : i32
    %c0_i32_0 = arith.constant 0 : i32
    return %arg0, %c0_i32 : i32, i32
  }
  func.func @transform_5(%arg0: i32, %arg1: i32) -> (i32, i32) {
    %c0_i32 = arith.constant 0 : i32
    %c0_i32_0 = arith.constant 0 : i32
    return %c0_i32, %arg1 : i32, i32
  }
  func.func @transform_6(%arg0: i32, %arg1: i32) -> (i32, i32) {
    %c0_i32 = arith.constant 0 : i32
    %c0_i32_0 = arith.constant 0 : i32
    return %arg0, %c0_i32 : i32, i32
  }
}

</mosaic_0001>

<bundles_post_ra>
// kernel: kg_learner_forward.1
= control target key start
LH: loop header
LB: loop body
LE: loop exit
PB: predicated region body
PF: predicated region fallthrough
CT: control target
= control target key end

     0   :  { %s1321_s21 = smov 0   ;;  %s1323_s22 = smov 0   ;;  %s1647_s0 = inlined_call_operand.vmem [shape: s8[64,384], index: 0, kind: input, shape index: {}]   ;;  %s1648_s1 = inlined_call_operand.vmem [shape: bf16[384,128], index: 1, kind: input, shape index: {}]   ;;  %s1649_s2 = inlined_call_operand.vmem [shape: f32[64,128], index: 2, kind: input, shape index: {}]   ;;  %s1650_s3 = inlined_call_operand.vmem [shape: f32[1,384], index: 3, kind: input, shape index: {}]   ;;  %s1651_s4 = inlined_call_operand.vmem [shape: f32[64,1], index: 4, kind: input, shape index: {}]   ;;  %s1652_s5 = inlined_call_operand.vmem [shape: f32[1,384], index: 5, kind: input, shape index: {}]   ;;  %s1653_s6 = inlined_call_operand.vmem [shape: f32[64,128], index: 6, kind: output, shape index: {}]  }
   0x1   :  { %s1325_s23 = smov 0  }
   0x2 LB: > { %s28_s24 = sadd.s32 1, %s1279_s22  ;;  %p1045_p0 = scmp.ge.s32.totalorder %s1283_s23, 1  ;;  %s1283_s23 = sphi %s1325_s23, %s16_s23   ;;  %s1279_s22 = sphi %s1323_s22, %s1655_s22   ;;  %s1275_s21 = sphi %s1321_s21, %s1654_s21  }
   0x3   : > { %p30_p1 = scmp.ge.s32.totalorder %s28_s24, 2  ;;  %p273_p2 = scmp.lt.s32.totalorder %s1283_s23, 3 }
   0x5   : > { %s1657_s24 = smov (%p30_p1, %s28_s24), 0  ;;  %p274_p3 = pnand %p1045_p0, %p273_p2 }
   0x6   : > { %s1047_s25 = sshll.u32 (!%p274_p3), %s1275_s21, 2  ;;  %p326_p5 = scmp.lt.s32.totalorder (!%p274_p3), %s1275_s21, 1 }
   0x7   : > { %277 = sbr.rel (%p274_p3) target bundleno = 454 (0x1c6), region = 44  ;;  %p336_p4 = scmp.lt.s32.totalorder (!%p274_p3), %s1047_s25, 7 }
   0xc   : > { %v1285_v0 = vmov 0   ;;  %s1659_s25 = smov (!%p336_p4, %s1047_s25), 7  ;;  %s1661_s21 = smov (!%p326_p5, %s1275_s21), 1  ;;  %v406_v13 = vld [vmem:[%s1650_s3] sm:$0x7]  ;;  %v1176_v26 = vld [vmem:[%s1648_s1 + $0x38] sm:$0xff] }
   0xd   : > { %1228 = vset.pattern.permute.xlu1 %v1285_v0  ;;  %1227 = vset.pattern.permute.xlu0 %v1285_v0  ;;  %s1339_s26 = sshll.u32 %s1659_s25, 3  ;;  %s1201_s30 = smul.u32 24, %s1661_s21  ;;  %v1359_v17 = vperm.slane %v406_v13, 0  ;;  %v482_v19 = vld [vmem:[%s1652_s5] sm:$0x7]  ;;  %v1370_v22 = vperm.slane %v406_v13, 1 }
   0xe   : > { %s350_s29 = scalar_lea.vmem %s1651_s4, %s1339_s26  ;;  %v1184_v27 = vld [vmem:[%s1648_s1 + $0x78] sm:$0xff]  ;;  %v1381_v29 = vperm.slane %v406_v13, 2  ;;  %v1387_v31 = vperm.slane %v482_v19, 0  ;;  %v1389_v32 = vperm.slane %v482_v19, 1  ;;  %785 = vmatpush.bf16.msra.mxu0 %v1176_v26  ;;  %1193 = vmatpush.bf16.msra.mxu3 %v1176_v26  ;;  %v1175_v35 = vld [vmem:[%s1648_s1 + $0x30] sm:$0xff]  ;;  %v1396_v36 = vperm.slane %v482_v19, 2  ;;  %s1611_s28 = scalar_lea.vmem %s1649_s2, %s1339_s26 }
   0xf   : > { %v404_v1 = vld [vmem:[%s350_s29 + $0x10] sm:$0xff]  ;;  %v402_v2 = vld [vmem:[%s350_s29] sm:$0xff]  ;;  %v405_v3 = vld [vmem:[%s350_s29 + $0x18] sm:$0xff]  ;;  %s333_s9 = scalar_lea.vmem %s1647_s0, %s1201_s30  ;;  %804 = vmatpush.bf16.msra.mxu1 %v1184_v27  ;;  %s1622_s7 = scalar_lea.vmem %s1653_s6, %s1339_s26 }
  0x10   : > { %419 = vperm.xlu1 %1228, %v404_v1   ;;  %409 = vperm.xlu0 %1227, %v402_v2   ;;  %v403_v4 = vld [vmem:[%s350_s29 + $0x8] sm:$0xff]  ;;  %v363_v5 = vld [vmem:[%s333_s9] sm:$0xff]  ;;  %v1348_v9 = vld [vmem:[%s333_s9 + $0x10] sm:$0xff] }
  0x11   : > { %v364_v6 = vld [vmem:[%s333_s9 + $0x8] sm:$0xff]  ;;  %v372_v7 = vunpack.c.2.s8 %v363_v5  ;;  %v374_v10 = vunpack.c.2.s8 %v1348_v9  ;;  %v366_v11 = vunpack.c.0.s8 %v363_v5  ;;  %v368_v16 = vunpack.c.0.s8 %v1348_v9  ;;  %v1192_v28 = vld [vmem:[%s1648_s1 + $0xb8] sm:$0xff]  ;;  %v1183_v37 = vld [vmem:[%s1648_s1 + $0x70] sm:$0xff] }
  0x12   : > { %v373_v8 = vunpack.c.2.s8 %v364_v6  ;;  %v367_v12 = vunpack.c.0.s8 %v364_v6  ;;  %v375_v23 = vunpack.c.3.s8 %v363_v5  ;;  %v376_v24 = vunpack.c.3.s8 %v364_v6  ;;  %823 = vmatpush.bf16.msra.mxu2 %v1192_v28  ;;  %v1191_v38 = vld [vmem:[%s1648_s1 + $0xb0] sm:$0xff]  ;;  %786 = vmatpush.bf16.msra.mxu0 %v1175_v35  ;;  %v1174_v53 = vld [vmem:[%s1648_s1 + $0x28] sm:$0xff] }
  0x13   : > { %v1354_v14 = vcvt.s32.f32 %v372_v7  ;;  %v1361_v18 = vcvt.s32.f32 %v374_v10  ;;  %v1366_v20 = vcvt.s32.f32 %v366_v11  ;;  %v369_v25 = vunpack.c.1.s8 %v363_v5  ;;  %1194 = vmatpush.bf16.msra.mxu3 %v1175_v35  ;;  %v1182_v54 = vld [vmem:[%s1648_s1 + $0x68] sm:$0xff]  ;;  %805 = vmatpush.bf16.msra.mxu1 %v1183_v37 }
  0x14   : > { %v1356_v15 = vcvt.s32.f32 %v373_v8  ;;  %v1368_v21 = vcvt.s32.f32 %v367_v12  ;;  %v1385_v30 = vcvt.s32.f32 %v368_v16  ;;  %v377_v33 = vunpack.c.3.s8 %v1348_v9  ;;  %v1190_v55 = vld [vmem:[%s1648_s1 + $0xa8] sm:$0xff] }
  0x15   : > { %vm396_vm0 = vcmp.gt.f32.partialorder %v1354_v14, 0.0  ;;  %v370_v34 = vunpack.c.1.s8 %v364_v6  ;;  %vm398_vm2 = vcmp.gt.f32.partialorder %v1361_v18, 0.0  ;;  %vm390_vm3 = vcmp.gt.f32.partialorder %v1366_v20, 0.0 }
  0x16   : > { %vm397_vm1 = vcmp.gt.f32.partialorder %v1356_v15, 0.0  ;;  %vm391_vm4 = vcmp.gt.f32.partialorder %v1368_v21, 0.0  ;;  %v1406_v41 = vcvt.s32.f32 %v375_v23  ;;  %v1408_v42 = vcvt.s32.f32 %v376_v24  ;;  %824 = vmatpush.bf16.msra.mxu2 %v1191_v38  ;;  %787 = vmatpush.bf16.msra.mxu0 %v1174_v53 }
  0x17   : > { %v371_v43 = vunpack.c.1.s8 %v1348_v9  ;;  %v1411_v44 = vcvt.s32.f32 %v369_v25  ;;  %vm392_vm5 = vcmp.gt.f32.partialorder %v1385_v30, 0.0  ;;  %v1422_v51 = vcvt.s32.f32 %v377_v33  ;;  %1195 = vmatpush.bf16.msra.mxu3 %v1174_v53  ;;  %806 = vmatpush.bf16.msra.mxu1 %v1182_v54 }
  0x18   : > { %424 = vperm.xlu1 %1228, %v405_v3   ;;  %414 = vperm.xlu0 %1227, %v403_v4   ;;  %v1424_v52 = vcvt.s32.f32 %v370_v34  ;;  %vm399_vm6 = vcmp.gt.f32.partialorder %v1406_v41, 0.0  ;;  %vm400_vm7 = vcmp.gt.f32.partialorder %v1408_v42, 0.0 }
  0x19   : > { %v1437_v62 = vcvt.s32.f32 %v371_v43  ;;  %vm401_vm8 = vcmp.gt.f32.partialorder %v1422_v51, 0.0  ;;  %vm393_vm9 = vcmp.gt.f32.partialorder %v1411_v44, 0.0  ;;  %vm1152_vm12 = vmpackc.low %vm399_vm6, %vm396_vm0 }
  0x1a   : > { %vm394_vm10 = vcmp.gt.f32.partialorder %v1424_v52, 0.0  ;;  %825 = vmatpush.bf16.msra.mxu2 %v1190_v55  ;;  %vm1149_vm13 = vmpackc.low %vm393_vm9, %vm390_vm3 }
  0x1b   : > { %vm395_vm11 = vcmp.gt.f32.partialorder %v1437_v62, 0.0  ;;  %vm1155_vm14 = vmpackc.low %vm394_vm10, %vm391_vm4 }
  0x1c   : > { %vm1161_vm15 = vmpackc.low %vm395_vm11, %vm392_vm5 }
  0x82   : > { %v420_v39 = vpop.permute.xlu1 %419  ;;  %v410_v40 = vpop.permute.xlu0 %409 }
  0x83   : > { %v440_v45 = vadd.f32 %v1359_v17, %v420_v39  ;;  %v441_v46 = vadd.f32 %v1370_v22, %v420_v39  ;;  %v442_v47 = vadd.f32 %v1381_v29, %v420_v39  ;;  %v434_v48 = vadd.f32 %v1359_v17, %v410_v40 }
  0x84   : > { %v435_v49 = vadd.f32 %v1370_v22, %v410_v40  ;;  %v1419_v50 = vadd.f32 %v1381_v29, %v410_v40 }
  0x85   : > { %v452_v56 = vmul.f32 0.2, %v440_v45  ;;  %v453_v57 = vmul.f32 0.2, %v441_v46  ;;  %v454_v58 = vmul.f32 0.2, %v442_v47 }
  0x86   : > { %v446_v59 = vmul.f32 0.2, %v434_v48  ;;  %v447_v60 = vmul.f32 0.2, %v435_v49  ;;  %v448_v61 = vmul.f32 0.2, %v1419_v50 }
  0x87   : > { %v464_v63 = vmax.f32 %v440_v45, %v452_v56  ;;  %v465_v0 = vmax.f32 %v441_v46, %v453_v57  ;;  %v466_v1 = vmax.f32 %v442_v47, %v454_v58 }
  0x88   : > { %v458_v2 = vmax.f32 %v434_v48, %v446_v59  ;;  %v459_v3 = vmax.f32 %v435_v49, %v447_v60  ;;  %v460_v7 = vmax.f32 %v1419_v50, %v448_v61 }
  0x89   : > { %v476_v4 = vsel %vm396_vm0, %v464_v63, 0.0  ;;  %v477_v5 = vsel %vm397_vm1, %v465_v0, 0.0  ;;  %v478_v6 = vsel %vm398_vm2, %v466_v1, 0.0  ;;  %vm1158_vm0 = vmpackc.low %vm400_vm7, %vm397_vm1 }
  0x8a   : > { %v425_v8 = vpop.permute.xlu1 %424  ;;  %v415_v9 = vpop.permute.xlu0 %414  ;;  %v1451_v10 = vadd.f32 %v1387_v31, %v476_v4  ;;  %v1454_v11 = vadd.f32 %v1389_v32, %v477_v5  ;;  %v1457_v12 = vadd.f32 %v1396_v36, %v478_v6  ;;  %v470_v13 = vsel %vm390_vm3, %v458_v2, 0.0  ;;  %vm1164_vm3 = vmpackc.low %vm401_vm8, %vm398_vm2 }
  0x8b   : > { %v443_v16 = vadd.f32 %v1359_v17, %v425_v8  ;;  %v444_v19 = vadd.f32 %v1370_v22, %v425_v8  ;;  %v445_v23 = vadd.f32 %v1381_v29, %v425_v8  ;;  %v437_v24 = vadd.f32 %v1359_v17, %v415_v9  ;;  %v1189_v8 = vld [vmem:[%s1648_s1 + $0xa0] sm:$0xff] }
  0x8c   : > { %v438_v25 = vadd.f32 %v1370_v22, %v415_v9  ;;  %v439_v26 = vadd.f32 %v1381_v29, %v415_v9  ;;  %v563_v27 = vmax.f32 %v1451_v10, %v1454_v11  ;;  %v471_v28 = vsel %vm391_vm4, %v459_v3, 0.0  ;;  %826 = vmatpush.bf16.msra.mxu2 %v1189_v8  ;;  %v1180_v9 = vld [vmem:[%s1648_s1 + $0x58] sm:$0xff] }
  0x8d   : > { %v455_v33 = vmul.f32 0.2, %v443_v16  ;;  %v456_v34 = vmul.f32 0.2, %v444_v19  ;;  %v457_v35 = vmul.f32 0.2, %v445_v23  ;;  %v1473_v37 = vadd.f32 %v1387_v31, %v470_v13 }
  0x8e   : > { %v449_v38 = vmul.f32 0.2, %v437_v24  ;;  %v450_v39 = vmul.f32 0.2, %v438_v25  ;;  %v451_v40 = vmul.f32 0.2, %v439_v26  ;;  %v564_v17 = vmax.f32 %v563_v27, %v1457_v12 }
  0x8f   : > { %v467_v22 = vmax.f32 %v443_v16, %v455_v33  ;;  %v468_v43 = vmax.f32 %v444_v19, %v456_v34  ;;  %v469_v29 = vmax.f32 %v445_v23, %v457_v35  ;;  %v472_v45 = vsel %vm392_vm5, %v460_v7, 0.0  ;;  %v1188_v13 = vld [vmem:[%s1648_s1 + $0x98] sm:$0xff]  ;;  %v1171_v16 = vld [vmem:[%s1648_s1 + $0x10] sm:$0xff]  ;;  %v1169_v27 = vld [vmem:[%s1648_s1] sm:$0xff] }
  0x90   : > { %v461_v46 = vmax.f32 %v437_v24, %v449_v38  ;;  %v462_v47 = vmax.f32 %v438_v25, %v450_v39  ;;  %v463_v48 = vmax.f32 %v439_v26, %v451_v40  ;;  %565 = vmax.xlane.f32.xlu0 %v564_v17  ;;  %v1479_v49 = vadd.f32 %v1389_v32, %v471_v28  ;;  %v1179_v19 = vld [vmem:[%s1648_s1 + $0x50] sm:$0xff]  ;;  %v1170_v24 = vld [vmem:[%s1648_s1 + $0x8] sm:$0xff]  ;;  %v1177_v28 = vld [vmem:[%s1648_s1 + $0x40] sm:$0xff] }
  0x91   : > { %v1482_v50 = vadd.f32 %v1396_v36, %v472_v45  ;;  %v479_v53 = vsel %vm399_vm6, %v467_v22, 0.0  ;;  %v480_v54 = vsel %vm400_vm7, %v468_v43, 0.0  ;;  %v481_v55 = vsel %vm401_vm8, %v469_v29, 0.0  ;;  %827 = vmatpush.bf16.msra.mxu2 %v1188_v13  ;;  %v1187_v23 = vld [vmem:[%s1648_s1 + $0x90] sm:$0xff]  ;;  %v1178_v25 = vld [vmem:[%s1648_s1 + $0x48] sm:$0xff]  ;;  %v1185_v33 = vld [vmem:[%s1648_s1 + $0x80] sm:$0xff] }
  0x92   : > { %v555_v56 = vmax.f32 %v1473_v37, %v1479_v49  ;;  %v1493_v57 = vadd.f32 %v1387_v31, %v479_v53  ;;  %v1496_v58 = vadd.f32 %v1389_v32, %v480_v54  ;;  %v1499_v59 = vadd.f32 %v1396_v36, %v481_v55  ;;  %v1186_v26 = vld [vmem:[%s1648_s1 + $0x88] sm:$0xff] }
  0x93   : > { %v473_v60 = vsel %vm393_vm9, %v461_v46, 0.0  ;;  %v474_v61 = vsel %vm394_vm10, %v462_v47, 0.0  ;;  %v475_v3 = vsel %vm395_vm11, %v463_v48, 0.0 }
  0x94   : > { %v556_v63 = vmax.f32 %v555_v56, %v1482_v50  ;;  %v567_v0 = vmax.f32 %v1493_v57, %v1496_v58  ;;  %v1509_v1 = vadd.f32 %v1387_v31, %v473_v60  ;;  %v1512_v2 = vadd.f32 %v1389_v32, %v474_v61  ;;  %v1173_v31 = vld [vmem:[%s1648_s1 + $0x20] sm:$0xff] }
  0x95   : > { %v1520_v6 = vadd.f32 %v1396_v36, %v475_v3  ;;  %v1181_v32 = vld [vmem:[%s1648_s1 + $0x60] sm:$0xff]  ;;  %788 = vmatpush.bf16.msra.mxu0 %v1173_v31  ;;  %1196 = vmatpush.bf16.msra.mxu3 %v1173_v31  ;;  %v1172_v36 = vld [vmem:[%s1648_s1 + $0x18] sm:$0xff] }
  0x96   : > { %557 = vmax.xlane.f32.xlu2 %v556_v63  ;;  %v568_v4 = vmax.f32 %v567_v0, %v1499_v59  ;;  %v559_v5 = vmax.f32 %v1509_v1, %v1512_v2  ;;  %807 = vmatpush.bf16.msra.mxu1 %v1181_v32 }
  0x97   : > { %828 = vmatpush.bf16.msra.mxu2 %v1187_v23 }
  0x98   : > { %569 = vmax.xlane.f32.xlu1 %v568_v4  ;;  %v560_v7 = vmax.f32 %v559_v5, %v1520_v6 }
  0x99   : > { %789 = vmatpush.bf16.msra.mxu0 %v1172_v36  ;;  %1197 = vmatpush.bf16.msra.mxu3 %v1172_v36 }
  0x9a   : > { %808 = vmatpush.bf16.msra.mxu1 %v1180_v9 }
  0x9b   : > { %829 = vmatpush.bf16.msra.mxu2 %v1186_v26 }
  0x9d   : > { %790 = vmatpush.bf16.msra.mxu0 %v1171_v16  ;;  %1198 = vmatpush.bf16.msra.mxu3 %v1171_v16 }
  0x9e   : > { %561 = vmax.xlane.f32.xlu2 %v560_v7  ;;  %809 = vmatpush.bf16.msra.mxu1 %v1179_v19 }
  0x9f   : > { %830 = vmatpush.bf16.msra.mxu2 %v1185_v33 }
  0xa1   : > { %791 = vmatpush.bf16.msra.mxu0 %v1170_v24  ;;  %1199 = vmatpush.bf16.msra.mxu3 %v1170_v24 }
  0xa2   : > { %810 = vmatpush.bf16.msra.mxu1 %v1178_v25 }
  0xa5   : > { %792 = vmatpush.bf16.msra.mxu0 %v1169_v27  ;;  %1200 = vmatpush.bf16.msra.mxu3 %v1169_v27 }
  0xa6   : > { %811 = vmatpush.bf16.msra.mxu1 %v1177_v28 }
 0x103   : > { %v566_v34 = vpop.xlane.xlu0 %565 }
 0x104   : > { %v577_v35 = vsub.f32 %v1451_v10, %v566_v34  ;;  %v578_v54 = vsub.f32 %v1454_v11, %v566_v34  ;;  %v579_v11 = vsub.f32 %v1457_v12, %v566_v34 }
 0x106   : > { %v595_v38 = vmul.f32 1.442695, %v577_v35  ;;  %v597_v4 = vmul.f32 1.442695, %v578_v54  ;;  %v599_v7 = vmul.f32 1.442695, %v579_v11 }
 0x108   : > { %1229 = vpow2.f32 %v595_v38 }
 0x109   : > { %v558_v39 = vpop.xlane.xlu2 %557 }
 0x10a   : > { %v571_v40 = vsub.f32 %v1473_v37, %v558_v39  ;;  %v572_v17 = vsub.f32 %v1479_v49, %v558_v39  ;;  %v573_v22 = vsub.f32 %v1482_v50, %v558_v39 }
 0x10b   : > { %v570_v43 = vpop.xlane.xlu1 %569 }
 0x10c   : > { %v583_v29 = vmul.f32 1.442695, %v571_v40  ;;  %v585_v45 = vmul.f32 1.442695, %v572_v17  ;;  %v587_v46 = vmul.f32 1.442695, %v573_v22  ;;  %v580_v47 = vsub.f32 %v1493_v57, %v570_v43 }
 0x10d   : > { %v581_v5 = vsub.f32 %v1496_v58, %v570_v43  ;;  %v582_v31 = vsub.f32 %v1499_v59, %v570_v43 }
 0x10e   : > { %1231 = vpow2.f32 %v583_v29  ;;  %v601_v48 = vmul.f32 1.442695, %v580_v47  ;;  %v1230_v50 = vpop.eup %1229 }
 0x10f   : > { %1233 = vpow2.f32 %v585_v45  ;;  %v603_v44 = vmul.f32 1.442695, %v581_v5  ;;  %v605_v21 = vmul.f32 1.442695, %v582_v31 }
 0x110   : > { %1235 = vpow2.f32 %v587_v46 }
 0x111   : > { %1237 = vpow2.f32 %v601_v48  ;;  %v562_v10 = vpop.xlane.xlu2 %561 }
 0x112   : > { %v574_v53 = vsub.f32 %v1509_v1, %v562_v10  ;;  %v575_v37 = vsub.f32 %v1512_v2, %v562_v10  ;;  %v576_v49 = vsub.f32 %v1520_v6, %v562_v10 }
 0x114   : > { %v1232_v55 = vpop.eup %1231  ;;  %v589_v56 = vmul.f32 1.442695, %v574_v53  ;;  %v591_v60 = vmul.f32 1.442695, %v575_v37  ;;  %v593_v57 = vmul.f32 1.442695, %v576_v49 }
 0x115   : > { %v1234_v61 = vpop.eup %1233  ;;  %v842_v37 = vld [vmem:[%s1611_s28] sm:$0xff] }
 0x116   : > { %v1236_v63 = vpop.eup %1235  ;;  %1239 = vpow2.f32 %v589_v56  ;;  %v607_v0 = vadd.f32 %v1234_v61, %v1232_v55 }
 0x117   : > { %v1238_v3 = vpop.eup %1237  ;;  %1241 = vpow2.f32 %v591_v60 }
 0x118   : > { %1243 = vpow2.f32 %v593_v57  ;;  %v608_v1 = vadd.f32 %v1236_v63, %v607_v0  ;;  %v1153_v2 = vpack.c.bf16 %v1238_v3, %v1230_v50 }
 0x119   : > { %1245 = vpow2.f32 %v597_v4 }
 0x11a   : > { %609 = vadd.xlane.f32.xlu2 %v608_v1  ;;  %1154 = vmatmul.msk.bf16.vlgmr.msra.gmra.mxu3 %vm1152_vm12, %v1153_v2  ;;  %1247 = vpow2.f32 %v599_v7 }
 0x11b   : > { %1249 = vpow2.f32 %v603_v44 }
 0x11c   : > { %v1240_v6 = vpop.eup %1239  ;;  %1251 = vpow2.f32 %v605_v21 }
 0x11d   : > { %v1242_v14 = vpop.eup %1241  ;;  %v1150_v41 = vpack.c.bf16 %v1240_v6, %v1232_v55 }
 0x11e   : > { %v1244_v12 = vpop.eup %1243  ;;  %v1156_v32 = vpack.c.bf16 %v1242_v14, %v1234_v61  ;;  %v611_v20 = vadd.f32 %v1242_v14, %v1240_v6  ;;  %v843_v14 = vld [vmem:[%s1611_s28 + $0x8] sm:$0xff] }
 0x11f   : > { %1151 = vmatmul.msk.bf16.vlgmr.msra.gmra.mxu0 %vm1149_vm13, %v1150_v41  ;;  %v1162_v58 = vpack.c.bf16 %v1244_v12, %v1236_v63  ;;  %v1246_v36 = vpop.eup %1245 }
 0x120   : > { %1157 = vmatmul.msk.bf16.vlgmr.msra.gmra.mxu1 %vm1155_vm14, %v1156_v32  ;;  %v612_v8 = vadd.f32 %v1244_v12, %v611_v20  ;;  %v615_v52 = vadd.f32 %v1246_v36, %v1230_v50  ;;  %v1248_v59 = vpop.eup %1247 }
 0x121   : > { %1163 = vmatmul.msk.bf16.vlgmr.msra.gmra.mxu2 %vm1161_vm15, %v1162_v58  ;;  %v1250_v30 = vpop.eup %1249 }
 0x122   : > { %613 = vadd.xlane.f32.xlu2 %v612_v8  ;;  %v616_v9 = vadd.f32 %v1248_v59, %v615_v52  ;;  %v1252_v62 = vpop.eup %1251  ;;  %v619_v13 = vadd.f32 %v1250_v30, %v1238_v3  ;;  %v1159_v16 = vpack.c.bf16 %v1250_v30, %v1246_v36 }
 0x123   : > { %v1165_v19 = vpack.c.bf16 %v1252_v62, %v1248_v59 }
 0x124   : > { %v620_v23 = vadd.f32 %v1252_v62, %v619_v13  ;;  %v844_v13 = vld [vmem:[%s1611_s28 + $0x10] sm:$0xff] }
 0x12a   : > { %617 = vadd.xlane.f32.xlu2 %v616_v9 }
 0x130   : > { %1160 = vmatmul.msk.bf16.gmra.mxu1 %vm1158_vm0, %v1159_v16 }
 0x131   : > { %1166 = vmatmul.msk.bf16.gmra.mxu2 %vm1164_vm3, %v1165_v19 }
 0x132   : > { %621 = vadd.xlane.f32.xlu2 %v620_v23 }
 0x18d   : > { %v610_v24 = vpop.xlane.xlu2 %609 }
 0x18e   : > { %1253 = vrcp.f32 %v610_v24  ;;  %v857_v39 = vand.u32 2147483648, %v610_v24  ;;  %vm851_vm2 = vweird.f32 %v610_v24  ;;  %v855_v40 = vand.u32 2147483647, %v610_v24 }
 0x190   : > { %v858_v46 = vor.u32 1.1754944e-38, %v857_v39  ;;  %vm856_vm5 = vcmp.eq.f32.partialorder %v855_v40, 8.507059e+37 }
 0x194   : > { %v1254_v25 = vpop.eup %1253 }
 0x195   : > { %v847_v26 = vmul.f32 %v1254_v25, %v610_v24  ;;  %v614_v27 = vpop.xlane.xlu2 %613  ;;  %vm852_vm1 = vweird.f32 %v1254_v25 }
 0x196   : > { %1255 = vrcp.f32 %v614_v27  ;;  %vm853_vm4 = vmor %vm851_vm2, %vm852_vm1  ;;  %v872_v60 = vand.u32 2147483648, %v614_v27  ;;  %vm866_vm7 = vweird.f32 %v614_v27  ;;  %v870_v61 = vand.u32 2147483647, %v614_v27 }
 0x197   : > { %v848_v15 = vsub.f32 1.0, %v847_v26 }
 0x198   : > { %v873_v11 = vor.u32 1.1754944e-38, %v872_v60  ;;  %vm871_vm9 = vcmp.eq.f32.partialorder %v870_v61, 8.507059e+37 }
 0x199   : > { %v849_v42 = vmul.f32 %v1254_v25, %v848_v15 }
 0x19b   : > { %v850_v38 = vadd.f32 %v1254_v25, %v849_v42 }
 0x19c   : > { %v1256_v28 = vpop.eup %1255  ;;  %v794_v51 = vpop.f32.mrf.mxu0 }
 0x19d   : > { %v862_v33 = vmul.f32 %v1256_v28, %v614_v27  ;;  %v813_v18 = vpop.f32.mrf.mxu1  ;;  %v1604_v34 = vpop.xlane.xlu2 %617  ;;  %v854_v43 = vsel %vm853_vm4, %v1254_v25, %v850_v38  ;;  %vm867_vm6 = vweird.f32 %v1256_v28 }
 0x19e   : > { %1257 = vrcp.f32 %v1604_v34  ;;  %v814_v22 = vadd.f32 %v813_v18, %v794_v51  ;;  %v859_v49 = vsel %vm856_vm5, %v858_v46, %v854_v43  ;;  %vm868_vm8 = vmor %vm866_vm7, %vm867_vm6  ;;  %v799_v20 = vpop.f32.mrf.mxu3  ;;  %v887_v44 = vand.u32 2147483648, %v1604_v34 }
 0x19f   : > { %v863_v35 = vsub.f32 1.0, %v862_v33  ;;  %vm881_vm11 = vweird.f32 %v1604_v34  ;;  %v885_v8 = vand.u32 2147483647, %v1604_v34 }
 0x1a0   : > { %v888_v30 = vor.u32 1.1754944e-38, %v887_v44 }
 0x1a1   : > { %v864_v17 = vmul.f32 %v1256_v28, %v863_v35  ;;  %vm886_vm13 = vcmp.eq.f32.partialorder %v885_v8, 8.507059e+37  ;;  %v845_v35 = vld [vmem:[%s1611_s28 + $0x18] sm:$0xff] }
 0x1a3   : > { %v865_v55 = vadd.f32 %v1256_v28, %v864_v17 }
 0x1a4   : > { %v1258_v29 = vpop.eup %1257  ;;  %v832_v45 = vpop.f32.mrf.mxu2 }
 0x1a5   : > { %v877_v47 = vmul.f32 %v1258_v29, %v1604_v34  ;;  %v833_v48 = vadd.f32 %v832_v45, %v814_v22  ;;  %v815_v10 = vpop.f32.mrf.mxu1  ;;  %v1614_v53 = vpop.xlane.xlu2 %621  ;;  %v869_v4 = vsel %vm868_vm8, %v1256_v28, %v865_v55  ;;  %vm882_vm10 = vweird.f32 %v1258_v29 }
 0x1a6   : > { %1259 = vrcp.f32 %v1614_v53  ;;  %v796_v56 = vpop.f32.mrf.mxu0  ;;  %v874_v7 = vsel %vm871_vm9, %v873_v11, %v869_v4  ;;  %vm883_vm12 = vmor %vm881_vm11, %vm882_vm10  ;;  %v902_v24 = vand.u32 2147483648, %v1614_v53  ;;  %vm896_vm15 = vweird.f32 %v1614_v53  ;;  %v801_v15 = vpop.f32.mrf.mxu3 }
 0x1a7   : > { %v878_v50 = vsub.f32 1.0, %v877_v47  ;;  %v860_v54 = vmul.f32 %v859_v49, %v833_v48  ;;  %v816_v3 = vadd.f32 %v815_v10, %v796_v56  ;;  %v900_v26 = vand.u32 2147483647, %v1614_v53 }
 0x1a8   : > { %v903_v18 = vor.u32 1.1754944e-38, %v902_v24 }
 0x1a9   : > { %v906_v57 = vadd.f32 %v860_v54, %v842_v37  ;;  %v879_v63 = vmul.f32 %v1258_v29, %v878_v50  ;;  %vm901_vm3 = vcmp.eq.f32.partialorder %v900_v26, 8.507059e+37 }
 0x1ab   : > { %v910_v0 = vmul.f32 0.5, %v906_v57  ;;  %v880_v32 = vadd.f32 %v1258_v29, %v879_v63 }
 0x1ac   : > { %v1260_v1 = vpop.eup %1259  ;;  %v834_v2 = vpop.f32.mrf.mxu2 }
 0x1ad   : > { %914 = vst [vmem:[%s1622_s7] sm:$0xff] %v910_v0  ;;  %v892_v5 = vmul.f32 %v1260_v1, %v1614_v53  ;;  %v835_v6 = vadd.f32 %v834_v2, %v816_v3  ;;  %v818_v41 = vpop.f32.mrf.mxu1  ;;  %v884_v59 = vsel %vm883_vm12, %v1258_v29, %v880_v32  ;;  %vm897_vm14 = vweird.f32 %v1260_v1 }
 0x1ae   : > { %v819_v52 = vadd.f32 %v818_v41, %v799_v20  ;;  %v889_v16 = vsel %vm886_vm13, %v888_v30, %v884_v59  ;;  %vm898_vm0 = vmor %vm896_vm15, %vm897_vm14 }
 0x1af   : > { %v893_v12 = vsub.f32 1.0, %v892_v5  ;;  %v875_v31 = vmul.f32 %v874_v7, %v835_v6 }
 0x1b1   : > { %v907_v58 = vadd.f32 %v875_v31, %v843_v14  ;;  %v894_v36 = vmul.f32 %v1260_v1, %v893_v12 }
 0x1b3   : > { %v911_v21 = vmul.f32 0.5, %v907_v58  ;;  %v895_v23 = vadd.f32 %v1260_v1, %v894_v36 }
 0x1b4   : > { %v837_v9 = vpop.f32.mrf.mxu2 }
 0x1b5   : > { %915 = vst [vmem:[%s1622_s7 + $0x8] sm:$0xff] %v911_v21  ;;  %v838_v62 = vadd.f32 %v837_v9, %v819_v52  ;;  %v820_v25 = vpop.f32.mrf.mxu1  ;;  %v899_v33 = vsel %vm898_vm0, %v1260_v1, %v895_v23 }
 0x1b6   : > { %v821_v28 = vadd.f32 %v820_v25, %v801_v15  ;;  %v904_v38 = vsel %vm901_vm3, %v903_v18, %v899_v33 }
 0x1b7   : > { %v890_v19 = vmul.f32 %v889_v16, %v838_v62 }
 0x1b9   : > { %v908_v27 = vadd.f32 %v890_v19, %v844_v13 }
 0x1bb   : > { %v912_v42 = vmul.f32 0.5, %v908_v27 }
 0x1bc   : > { %v839_v34 = vpop.f32.mrf.mxu2 }
 0x1bd   : > { %916 = vst [vmem:[%s1622_s7 + $0x10] sm:$0xff] %v912_v42  ;;  %v840_v51 = vadd.f32 %v839_v34, %v821_v28 }
 0x1bf   : > { %v905_v39 = vmul.f32 %v904_v38, %v840_v51 }
 0x1c1   : > { %v909_v40 = vadd.f32 %v905_v39, %v845_v35 }
 0x1c3   : > { %v913_v17 = vmul.f32 0.5, %v909_v40 }
 0x1c5   : > { %917 = vst [vmem:[%s1622_s7 + $0x18] sm:$0xff] %v913_v17 }
 0x1c6 PF: > { %s16_s23 = sadd.s32 1, %s1283_s23   ;;  %s1654_s21 = smov %s1279_s22 }
 0x1c7   : > { %p13_p6 = scmp.ge.s32.totalorder %s16_s23, 4   ;;  %s1655_s22 = smov %s1657_s24 }
 0x1c9   :  { %15 = sbr.rel (!%p13_p6) target bundleno = 2 (0x2), region = 87 }

</bundles_post_ra>
